<compile_context>
chip_gen: v7x
topology: tpu7x:2x2x1
jax: 0.10.0
libtpu: 0.0.40
codegen_flags: <defaults>
</compile_context>

<pallas_src>
import jax
import jax.numpy as jnp
from jax.experimental import pallas as pl
from jax.experimental.pallas import tpu as pltpu

LANES = 128
SUBLANES = 8
MAX_TILE_ROWS = 2048    # 2048 x 128 f32 = 1 MiB per input per block
NUM_CORE_SPLITS = 2     # leading "parallel" grid axis (both TCs on v7x)


def _soft_f1_partial_kernel(pred_ref, tgt_ref, out_ref):
    step = pl.program_id(1)

    @pl.when(step == 0)
    def _init():
        out_ref[...] = jnp.zeros_like(out_ref)

    # minority-class transform: target -> 1 - target, pred -> -pred
    p = jax.nn.sigmoid(-pred_ref[...].astype(jnp.float32))
    t = 1.0 - tgt_ref[...].astype(jnp.float32)

    def fold(x):
        # (TILE_ROWS, 128) -> (8, 128): reshape keeps the (8,128) minor tile,
        # the axis-0 sum lowers to plain VPU adds (no cross-lane traffic).
        return jnp.sum(x.reshape(-1, SUBLANES, LANES), axis=0)

    out_ref[0, 0, :, :] += fold(t * p)   # sum(t * p)  -> tp
    out_ref[0, 1, :, :] += fold(t)       # sum(t)      -> tp + fn
    out_ref[0, 2, :, :] += fold(p)       # sum(p)      -> tp + fp


def _round_up(x: int, m: int) -> int:
    return ((x + m - 1) // m) * m


def soft_f1_loss_minority_class(pred: jax.Array, target: jax.Array) -> jax.Array:
    """Pallas implementation of SoftF1LossMinorityClass.forward. Returns scalar f32."""
    n = pred.size
    pred_f = pred.reshape(-1)      # contiguous flatten: no copy
    tgt_f = target.reshape(-1)

    rows = pl.cdiv(n, LANES)
    tile_rows = min(MAX_TILE_ROWS,
                    _round_up(pl.cdiv(rows, NUM_CORE_SPLITS), SUBLANES))
    steps = pl.cdiv(rows, NUM_CORE_SPLITS * tile_rows)
    rows_padded = NUM_CORE_SPLITS * steps * tile_rows
    pad = rows_padded * LANES - n

    if pad:
        # Sentinel padding: sigmoid(-1e4) == 0 and (1 - 1) == 0, so padded
        # elements contribute exactly zero to every accumulated sum.
        pred_f = jnp.pad(pred_f, (0, pad),
                         constant_values=jnp.asarray(10000, pred_f.dtype))
        tgt_f = jnp.pad(tgt_f, (0, pad),
                        constant_values=jnp.asarray(1, tgt_f.dtype))

    pred_2d = pred_f.reshape(rows_padded, LANES)
    tgt_2d = tgt_f.reshape(rows_padded, LANES)

    def in_index_map(c, i):
        # core c owns a contiguous span of `steps` row-tiles
        return (c * steps + i, 0)

    def out_index_map(c, i):
        # resident across the reduction ("arbitrary") axis, per-core block
        return (c, 0, 0, 0)

    in_spec = pl.BlockSpec((tile_rows, LANES), in_index_map)
    out_spec = pl.BlockSpec((1, 3, SUBLANES, LANES), out_index_map)

    partials = pl.pallas_call(
        _soft_f1_partial_kernel,
        out_shape=jax.ShapeDtypeStruct((NUM_CORE_SPLITS, 3, SUBLANES, LANES),
                                       jnp.float32),
        grid_spec=pltpu.PrefetchScalarGridSpec(
            num_scalar_prefetch=0,
            grid=(NUM_CORE_SPLITS, steps),
            in_specs=[in_spec, in_spec],
            out_specs=out_spec,
        ),
        compiler_params=pltpu.CompilerParams(
            dimension_semantics=("parallel", "arbitrary"),
        ),
    )(pred_2d, tgt_2d)

    # Tiny epilogue (a few KB): combine per-core (8,128)-tiled partial sums
    # and apply the scalar soft-F1 formula.
    sums = jnp.sum(partials, axis=(0, 2, 3))           # (3,): [s_tp, s_t, s_p]
    s_tp, s_t, s_p = sums[0], sums[1], sums[2]
    fp = s_p - s_tp
    fn = s_t - s_tp
    prec = s_tp / (s_tp + fp + 1e-16)
    rec = s_tp / (s_tp + fn + 1e-16)
    soft_f1 = 2.0 * prec * rec / (prec + rec + 1e-16)
    return 1.0 - soft_f1


def _reference(pred, target):
    # pure-JAX reference mirroring the PyTorch module
    target = 1.0 - target.astype(jnp.float32)
    pred = jax.nn.sigmoid(-pred.astype(jnp.float32))
    tp = jnp.sum(target * pred)
    fp = jnp.sum((1.0 - target) * pred)
    fn = jnp.sum(target * (1.0 - pred))
    p = tp / (tp + fp + 1e-16)
    r = tp / (tp + fn + 1e-16)
    soft_f1 = 2.0 * p * r / (p + r + 1e-16)
    return 1.0 - soft_f1


if __name__ == "__main__":
    key = jax.random.PRNGKey(0)
    k1, k2 = jax.random.split(key)
    # small shapes consistent with a segmentation-style logits/target pair
    pred = jax.random.normal(k1, (2, 4, 16, 16), dtype=jnp.float32)
    target = jax.random.bernoulli(k2, p=0.3, shape=(2, 4, 16, 16)).astype(jnp.float32)

    loss = soft_f1_loss_minority_class(pred, target)
    jax.block_until_ready(loss)

    ref = _reference(pred, target)
    assert jnp.allclose(loss, ref, atol=1e-5, rtol=1e-5), (loss, ref)
    print("KERNEL_OK")
</pallas_src>

<mosaic_0001>
module attributes {stable_mosaic.version = 11 : i64} {
  func.func @_soft_f1_partial_kernel(%arg0: i32, %arg1: i32, %arg2: memref<8x128xf32, #tpu.memory_space<vmem>>, %arg3: memref<8x128xf32, #tpu.memory_space<vmem>>, %arg4: memref<1x3x8x128xf32, #tpu.memory_space<vmem>>) attributes {dimension_semantics = [#tpu.dimension_semantics<parallel>, #tpu.dimension_semantics<arbitrary>], iteration_bounds = array<i64: 2, 1>, scalar_prefetch = 0 : i64, scratch_operands = 0 : i64, tpu.core_type = #tpu.core_type<tc>, window_params = [{transform_indices = @transform_0, window_bounds = array<i64: 8, 128>}, {transform_indices = @transform_1, window_bounds = array<i64: 8, 128>}, {transform_indices = @transform_2, window_bounds = array<i64: 1, 3, 8, 128>}]} {
    %c0_i32 = arith.constant 0 : i32
    %0 = arith.cmpi eq, %arg1, %c0_i32 : i32
    %1 = arith.extui %0 : i1 to i32
    %c0_i32_0 = arith.constant 0 : i32
    %2 = arith.cmpi ne, %1, %c0_i32_0 : i32
    scf.if %2 {
      %cst_31 = arith.constant 0.000000e+00 : f32
      %39 = vector.broadcast %cst_31 : f32 to vector<1x3x8x128xf32>
      %c0_32 = arith.constant 0 : index
      %c0_33 = arith.constant 0 : index
      %c0_34 = arith.constant 0 : index
      %c0_35 = arith.constant 0 : index
      %40 = vector.load %arg4[%c0_32, %c0_33, %c0_34, %c0_35] : memref<1x3x8x128xf32, #tpu.memory_space<vmem>>, vector<1x3x8x128xf32>
      tpu.vector_store %arg4[%c0_32, %c0_33, %c0_34, %c0_35], %39 {strides = array<i32>} : memref<1x3x8x128xf32, #tpu.memory_space<vmem>>, vector<1x3x8x128xf32>,
    } else {
    }
    %c0 = arith.constant 0 : index
    %c0_1 = arith.constant 0 : index
    %3 = vector.load %arg2[%c0, %c0_1] : memref<8x128xf32, #tpu.memory_space<vmem>>, vector<8x128xf32>
    %cst = arith.constant 0.000000e+00 : f32
    %4 = vector.broadcast %cst : f32 to vector<8x128xf32>
    %5 = arith.subf %4, %3 : vector<8x128xf32>
    %6 = arith.negf %5 : vector<8x128xf32>
    %7 = math.exp %6 : vector<8x128xf32>
    %cst_2 = arith.constant 1.000000e+00 : f32
    %8 = vector.broadcast %cst_2 : f32 to vector<8x128xf32>
    %9 = arith.addf %8, %7 : vector<8x128xf32>
    %10 = arith.divf %8, %9 : vector<8x128xf32>
    %c0_3 = arith.constant 0 : index
    %c0_4 = arith.constant 0 : index
    %11 = vector.load %arg3[%c0_3, %c0_4] : memref<8x128xf32, #tpu.memory_space<vmem>>, vector<8x128xf32>
    %cst_5 = arith.constant 1.000000e+00 : f32
    %12 = vector.broadcast %cst_5 : f32 to vector<8x128xf32>
    %13 = arith.subf %12, %11 : vector<8x128xf32>
    %c0_6 = arith.constant 0 : index
    %c0_7 = arith.constant 0 : index
    %c0_8 = arith.constant 0 : index
    %c0_9 = arith.constant 0 : index
    %14 = vector.load %arg4[%c0_6, %c0_7, %c0_8, %c0_9] : memref<1x3x8x128xf32, #tpu.memory_space<vmem>>, vector<1x1x8x128xf32>
    %15 = vector.shape_cast %14 : vector<1x1x8x128xf32> to vector<8x128xf32>
    %16 = arith.mulf %13, %10 : vector<8x128xf32>
    %17 = vector.shape_cast %16 : vector<8x128xf32> to vector<1x8x128xf32>
    %cst_10 = arith.constant dense<0.000000e+00> : vector<8x128xf32>
    %18 = vector.multi_reduction <add>, %17, %cst_10 [0] : vector<1x8x128xf32> to vector<8x128xf32>
    %19 = arith.addf %15, %18 : vector<8x128xf32>
    %c0_11 = arith.constant 0 : index
    %c0_12 = arith.constant 0 : index
    %c0_13 = arith.constant 0 : index
    %c0_14 = arith.constant 0 : index
    %20 = vector.load %arg4[%c0_11, %c0_12, %c0_13, %c0_14] : memref<1x3x8x128xf32, #tpu.memory_space<vmem>>, vector<1x1x8x128xf32>
    %21 = vector.shape_cast %20 : vector<1x1x8x128xf32> to vector<8x128xf32>
    %22 = vector.shape_cast %19 : vector<8x128xf32> to vector<1x1x8x128xf32>
    tpu.vector_store %arg4[%c0_11, %c0_12, %c0_13, %c0_14], %22 {strides = array<i32>} : memref<1x3x8x128xf32, #tpu.memory_space<vmem>>, vector<1x1x8x128xf32>,
    %c0_15 = arith.constant 0 : index
    %c1 = arith.constant 1 : index
    %c0_16 = arith.constant 0 : index
    %c0_17 = arith.constant 0 : index
    %23 = vector.load %arg4[%c0_15, %c1, %c0_16, %c0_17] : memref<1x3x8x128xf32, #tpu.memory_space<vmem>>, vector<1x1x8x128xf32>
    %24 = vector.shape_cast %23 : vector<1x1x8x128xf32> to vector<8x128xf32>
    %25 = vector.shape_cast %13 : vector<8x128xf32> to vector<1x8x128xf32>
    %cst_18 = arith.constant dense<0.000000e+00> : vector<8x128xf32>
    %26 = vector.multi_reduction <add>, %25, %cst_18 [0] : vector<1x8x128xf32> to vector<8x128xf32>
    %27 = arith.addf %24, %26 : vector<8x128xf32>
    %c0_19 = arith.constant 0 : index
    %c1_20 = arith.constant 1 : index
    %c0_21 = arith.constant 0 : index
    %c0_22 = arith.constant 0 : index
    %28 = vector.load %arg4[%c0_19, %c1_20, %c0_21, %c0_22] : memref<1x3x8x128xf32, #tpu.memory_space<vmem>>, vector<1x1x8x128xf32>
    %29 = vector.shape_cast %28 : vector<1x1x8x128xf32> to vector<8x128xf32>
    %30 = vector.shape_cast %27 : vector<8x128xf32> to vector<1x1x8x128xf32>
    tpu.vector_store %arg4[%c0_19, %c1_20, %c0_21, %c0_22], %30 {strides = array<i32>} : memref<1x3x8x128xf32, #tpu.memory_space<vmem>>, vector<1x1x8x128xf32>,
    %c0_23 = arith.constant 0 : index
    %c2 = arith.constant 2 : index
    %c0_24 = arith.constant 0 : index
    %c0_25 = arith.constant 0 : index
    %31 = vector.load %arg4[%c0_23, %c2, %c0_24, %c0_25] : memref<1x3x8x128xf32, #tpu.memory_space<vmem>>, vector<1x1x8x128xf32>
    %32 = vector.shape_cast %31 : vector<1x1x8x128xf32> to vector<8x128xf32>
    %33 = vector.shape_cast %10 : vector<8x128xf32> to vector<1x8x128xf32>
    %cst_26 = arith.constant dense<0.000000e+00> : vector<8x128xf32>
    %34 = vector.multi_reduction <add>, %33, %cst_26 [0] : vector<1x8x128xf32> to vector<8x128xf32>
    %35 = arith.addf %32, %34 : vector<8x128xf32>
    %c0_27 = arith.constant 0 : index
    %c2_28 = arith.constant 2 : index
    %c0_29 = arith.constant 0 : index
    %c0_30 = arith.constant 0 : index
    %36 = vector.load %arg4[%c0_27, %c2_28, %c0_29, %c0_30] : memref<1x3x8x128xf32, #tpu.memory_space<vmem>>, vector<1x1x8x128xf32>
    %37 = vector.shape_cast %36 : vector<1x1x8x128xf32> to vector<8x128xf32>
    %38 = vector.shape_cast %35 : vector<8x128xf32> to vector<1x1x8x128xf32>
    tpu.vector_store %arg4[%c0_27, %c2_28, %c0_29, %c0_30], %38 {strides = array<i32>} : memref<1x3x8x128xf32, #tpu.memory_space<vmem>>, vector<1x1x8x128xf32>,
    return
  }
  func.func @transform_0(%arg0: i32, %arg1: i32) -> (i32, i32) {
    %c1_i32 = arith.constant 1 : i32
    %0 = arith.muli %arg0, %c1_i32 : i32
    %1 = arith.addi %0, %arg1 : i32
    %c0_i32 = arith.constant 0 : i32
    %c0_i32_0 = arith.constant 0 : i32
    return %1, %c0_i32 : i32, i32
  }
  func.func @transform_1(%arg0: i32, %arg1: i32) -> (i32, i32) {
    %c1_i32 = arith.constant 1 : i32
    %0 = arith.muli %arg0, %c1_i32 : i32
    %1 = arith.addi %0, %arg1 : i32
    %c0_i32 = arith.constant 0 : i32
    %c0_i32_0 = arith.constant 0 : i32
    return %1, %c0_i32 : i32, i32
  }
  func.func @transform_2(%arg0: i32, %arg1: i32) -> (i32, i32, i32, i32) {
    %c0_i32 = arith.constant 0 : i32
    %c0_i32_0 = arith.constant 0 : i32
    %c0_i32_1 = arith.constant 0 : i32
    %c0_i32_2 = arith.constant 0 : i32
    return %arg0, %c0_i32, %c0_i32_0, %c0_i32_1 : i32, i32, i32, i32
  }
}

</mosaic_0001>

<bundles_post_ra>
// kernel: tpu_custom_call.1
= control target key start
LH: loop header
LB: loop body
LE: loop exit
PB: predicated region body
PF: predicated region fallthrough
CT: control target
= control target key end

     0   :  { %7 = vsyncpa [#allocation3], 0  ;;  %s854_s0 = inlined_call_operand.hbm [shape: f32[16,128], index: 0, kind: input, shape index: {}]   ;;  %s855_s1 = inlined_call_operand.hbm [shape: f32[16,128], index: 1, kind: input, shape index: {}]   ;;  %s856_s2 = inlined_call_operand.hbm [shape: f32[2,3,8,128], index: 2, kind: output, shape index: {}]  }
   0x1   :  { %9 = vsyncpa [#allocation3 + $0x1], 0 }
   0x2   :  { %10 = vsyncpa [#allocation6], 0 }
   0x3   :  { %12 = vsyncpa [#allocation6 + $0x1], 0 }
   0x4   :  { %13 = vsyncpa [#allocation4], 0 }
   0x5   :  { %15 = vsyncpa [#allocation4 + $0x1], 0  ;;  %s631_s9 = smov 0   ;;  %s633_s10 = smov 0  }
   0x6   :  { %s635_s11 = smov 0   ;;  %s637_s12 = smov 0  }
   0x7   :  { %s639_s13 = smov 0   ;;  %s641_s14 = smov 0  }
   0x8 LB: > { %s368_s15 = sadd.s32 4294967295, %s609_s14   ;;  %s369_s16 = sadd.s32 4294967294, %s609_s14   ;;  %s609_s14 = sphi %s641_s14, %s21_s14   ;;  %s605_s13 = sphi %s639_s13, %s876_s13   ;;  %s601_s12 = sphi %s637_s12, %s875_s12   ;;  %s597_s11 = sphi %s635_s11, %s874_s11   ;;  %s593_s10 = sphi %s633_s10, %s873_s10   ;;  %s589_s9 = sphi %s631_s9, %s872_s9  }
   0x9   : > { %s33_s17 = sadd.s32 1, %s605_s13  ;;  %s42_s18 = sadd.s32 1, %s597_s11 }
   0xa   : > { %p35_p0 = scmp.ge.s32.totalorder %s33_s17, 2  ;;  %p49_p1 = scmp.ne.s32.totalorder %s597_s11, %s593_s10 }
   0xb   : > { %p50_p2 = scmp.eq.s32.totalorder %s609_s14, 0  ;;  %p55_p3 = scmp.ne.s32.totalorder %s593_s10, %s589_s9 }
   0xc   : > { %s878_s17 = smov (%p35_p0, %s33_s17), 0  ;;  %p56_p5 = scmp.eq.s32.totalorder %s368_s15, 0 }
   0xd   : > { %p672_p4 = por %p50_p2, %p49_p1  ;;  %s39_s20 = ssub.s32 %s605_s13, %s878_s17 }
   0xe   : > { %p107_p6 = scmp.eq.s32.totalorder %s368_s15, 1  ;;  %p40_p7 = scmp.eq.s32.totalorder %s39_s20, 0 }
   0xf   : > { %p678_p8 = por %p56_p5, %p55_p3  ;;  %p113_p10 = scmp.eq.s32.totalorder %s369_s16, 1 }
  0x10   : > { %p682_p9 = por %p107_p6, %p49_p1  ;;  %p406_p13 = scmp.lt.s32.totalorder %s609_s14, 2 }
  0x11   : > { %s860_s21 = scalar_select %p678_p8, 1, 0 }
  0x12   : > { %s861_s22 = scalar_select %p682_p9, 1, 0 }
  0x13   : > { %s687_s23 = scalar_select %p40_p7, %s597_s11, %s42_s18  }
  0x14   : > { %p689_p11 = por %p113_p10, %p55_p3  ;;  %s696_s25 = sand.u32 1, %s597_s11  }
  0x15   : > { %s372_s26 = sshll.u32 %s696_s25, 3  ;;  %s373_s27 = sshll.u32 %s605_s13, 7 }
  0x16   : > { %s862_s24 = scalar_select %p689_p11, 1, 0 }
  0x17   : > { %s705_s30 = scalar_lea.hbm %s854_s0, %s373_s27  ;;  %s137_s3 = scalar_lea.vmem [#allocation2], %s372_s26 }
  0x18   : > { %s145_s4 = sshll.u32 %s137_s3, 4  ;;  %p713_p0 = pnand %p406_p13, %p672_p4  ;;  %s709_s4 = int_to_ptr.vmem [resolvable:$true] %s145_s4 }
  0x19   : > { %s134_s6 = scalar_lea.sflag [#allocation3], %s696_s25  ;;  %s463_s7 = scalar_lea.hbm %s705_s30, 128 }
  0x1a   : > { %p464_p3 = scmp.ne.s32.totalorder %s705_s30, %s463_s7  ;;  %p465_p5 = pneg %p713_p0 }
  0x1b   : > { %s468_s16 = scalar_lea.hbm %s854_s0, 256  ;;  %p469_p4 = scmp.lt.u32.totalorder %s705_s30, %s854_s0 }
  0x1c   : > { %p466_p6 = pnand %p465_p5, %p464_p3  ;;  %p470_p10 = scmp.lt.u32.totalorder %s468_s16, %s463_s7 }
  0x1d   : > { %p472_p12 = scmp.lt.u32.totalorder %s463_s7, %s705_s30 }
  0x1e   : > { %p467_p7 = pneg %p466_p6  ;;  %p471_p13 = por %p470_p10, %p469_p4 }
  0x20   : > { %p473_p1 = por %p472_p12, %p471_p13 }
  0x22   : > { %p474_p2 = pnand %p473_p1, %p467_p7 }
  0x24   : > { %477 = shalt.err (!%p474_p2)
}
  0x25   : > { %s478_s20 = scalar_lea.vmem %s709_s4, 128  ;;  %s611_s28 = smov [#allocation2]  }
  0x26   : > { %p479_p3 = scmp.ne.s32.totalorder %s709_s4, %s478_s20  ;;  %s483_s29 = sshll.u32 %s611_s28, 4  ;;  %s484_s29 = int_to_ptr.vmem [resolvable:$false] %s483_s29 }
  0x27   : > { %s485_s3 = scalar_lea.vmem %s484_s29, 256  ;;  %p486_p9 = scmp.lt.s32.totalorder %s709_s4, %s484_s29 }
  0x28   : > { %p481_p6 = pnand %p479_p3, %p465_p5  ;;  %p487_p4 = scmp.lt.s32.totalorder %s485_s3, %s478_s20 }
  0x2a   : > { %p482_p11 = pneg %p481_p6  ;;  %p488_p10 = por %p487_p4, %p486_p9 }
  0x2c   : > { %p489_p12 = pnand %p488_p10, %p482_p11 }
  0x2e   : > { %492 = shalt.err (!%p489_p12)
}
  0x2f   : > { %398 = dma.hbm_to_vmem [thread:$0]  (!%p713_p0), %s705_s30, 128, %s709_s4, %s134_s6  }
  0x30   : > { %p864_p1 = scmp.lt.s32.totalorder %s609_s14, 3  ;;  %p865_p2 = scmp.ge.s32.totalorder %s609_s14, 1 }
  0x31   : > { %s758_s16 = scalar_lea.hbm %s855_s1, %s373_s27  ;;  %s156_s18 = scalar_lea.vmem [#allocation5], %s372_s26 }
  0x32   : > { %p749_p7 = pnand %p865_p2, %p864_p1  ;;  %s164_s19 = sshll.u32 %s156_s18, 4  ;;  %s165_s19 = int_to_ptr.vmem [resolvable:$true] %s164_s19 }
  0x33   : > { %s153_s30 = scalar_lea.sflag [#allocation6], %s696_s25  ;;  %s493_s4 = scalar_lea.hbm %s758_s16, 128 }
  0x34   : > { %s866_s7 = scalar_select %p749_p7, 1, 0 }
  0x35   : > { %p494_p9 = scmp.ne.s32.totalorder %s758_s16, %s493_s4  ;;  %s498_s27 = scalar_lea.hbm %s855_s1, 256 }
  0x36   : > { %p499_p3 = scmp.lt.u32.totalorder %s758_s16, %s855_s1  ;;  %p500_p6 = scmp.lt.u32.totalorder %s498_s27, %s493_s4 }
  0x37   : > { %p496_p11 = pnand %p494_p9, %p465_p5  ;;  %p502_p10 = scmp.lt.u32.totalorder %s493_s4, %s758_s16 }
  0x38   : > { %p501_p4 = por %p500_p6, %p499_p3 }
  0x39   : > { %p497_p13 = pneg %p496_p11 }
  0x3a   : > { %p503_p12 = por %p502_p10, %p501_p4 }
  0x3c   : > { %p504_p1 = pnand %p503_p12, %p497_p13 }
  0x3e   : > { %507 = shalt.err (!%p504_p1)
}
  0x3f   : > { %s508_s25 = scalar_lea.vmem %s165_s19, 128  ;;  %s612_s26 = smov [#allocation5]  }
  0x40   : > { %p509_p2 = scmp.ne.s32.totalorder %s165_s19, %s508_s25  ;;  %s513_s3 = sshll.u32 %s612_s26, 4  ;;  %s514_s3 = int_to_ptr.vmem [resolvable:$false] %s513_s3 }
  0x41   : > { %s515_s8 = scalar_lea.vmem %s514_s3, 256  ;;  %p516_p8 = scmp.lt.s32.totalorder %s165_s19, %s514_s3 }
  0x42   : > { %p511_p9 = pnand %p509_p2, %p465_p5  ;;  %p517_p7 = scmp.lt.s32.totalorder %s515_s8, %s508_s25 }
  0x44   : > { %p512_p11 = pneg %p511_p9  ;;  %p518_p3 = por %p517_p7, %p516_p8 }
  0x46   : > { %p519_p6 = pnand %p518_p3, %p512_p11 }
  0x48   : > { %522 = shalt.err (!%p519_p6)
}
  0x49   : > { %401 = dma.hbm_to_vmem [thread:$0]  (!%p713_p0), %s758_s16, 128, %s165_s19, %s153_s30  }
  0x4a   : > { %p867_p13 = scmp.ne.s32.totalorder %s866_s7, 0 }
  0x4b   : > { %s785_s15 = sand.u32 (!%p867_p13), 1, %s593_s10   ;;  %p868_p5 = scmp.ne.s32.totalorder (!%p867_p13), %s860_s21, 0 }
  0x4c   : > { %173 = sbr.rel (%p867_p13) target bundleno = 132 (0x84), region = 28  ;;  %s377_s18 = sshll.u32 (!%p867_p13), %s785_s15, 3 }
  0x4d   : > { %s176_s4 = scalar_lea.sflag (!%p867_p13), [#allocation3], %s785_s15  ;;  %s179_s6 = scalar_lea.vmem (!%p867_p13), [#allocation2], %s377_s18 }
  0x53   : > { %576 = dma.done.wait (%p868_p5), %s176_s4, 128  }
  0x54   : > { %578 = vsyncadd (%p868_p5), %s176_s4, 4294967168  ;;  %s185_s5 = scalar_lea.sflag [#allocation6], %s785_s15  ;;  %s188_s16 = scalar_lea.vmem [#allocation5], %s377_s18 }
  0x55   : > { %580 = dma.done.wait (%p868_p5), %s185_s5, 128  }
  0x56   : > { %582 = vsyncadd (%p868_p5), %s185_s5, 4294967168  ;;  %s387_s7 = smul.u32 24, %s785_s15  ;;  %v223_v0 = vld [vmem:[%s179_s6] sm:$0xff]  ;;  %v231_v1 = vld [vmem:[%s188_s16] sm:$0xff]  ;;  %s249_s29 = scalar_lea.sflag [#allocation4], %s785_s15 }
  0x57   : > { %v224_v2 = vsub.f32 0.0, %v223_v0  ;;  %v232_v3 = vsub.f32 1.0, %v231_v1  ;;  %s388_s30 = smul.u32 384, %s601_s12  ;;  %p869_p0 = scmp.ne.s32.totalorder %s861_s22, 0 }
  0x58   : > { %s213_s19 = scalar_lea.vmem [#allocation7], %s387_s7  ;;  %s613_s12 = smov [#allocation7]  }
  0x59   : > { %v379_v4 = vmul.f32 -1.442695, %v224_v2  ;;  %381 = vst [vmem:[%s213_s19 + $0x8] sm:$0xff] %v232_v3  ;;  %s262_s21 = sshll.u32 %s213_s19, 4  ;;  %s803_s28 = scalar_lea.hbm %s856_s2, %s388_s30  ;;  %s805_s21 = int_to_ptr.vmem [resolvable:$true] %s262_s21 }
  0x5a   : > { %s523_s25 = scalar_lea.vmem %s805_s21, 384  ;;  %s527_s26 = sshll.u32 %s613_s12, 4  ;;  %s528_s26 = int_to_ptr.vmem [resolvable:$false] %s527_s26 }
  0x5b   : > { %459 = vpow2.f32 %v379_v4  ;;  %p524_p8 = scmp.ne.s32.totalorder %s805_s21, %s523_s25  ;;  %s529_s3 = scalar_lea.vmem %s528_s26, 768 }
  0x5c   : > { %p530_p10 = scmp.lt.s32.totalorder %s805_s21, %s528_s26  ;;  %p531_p12 = scmp.lt.s32.totalorder %s529_s3, %s523_s25 }
  0x5d   : > { %p525_p7 = pnand %p524_p8, %p869_p0 }
  0x5e   : > { %p532_p1 = por %p531_p12, %p530_p10 }
  0x5f   : > { %p526_p4 = pneg %p525_p7 }
  0x61   : > { %p533_p2 = pnand %p532_p1, %p526_p4 }
  0x65   : > { %v460_v5 = vpop.eup %459 }
  0x66   : > { %v228_v6 = vadd.f32 1.0, %v460_v5 }
  0x68   : > { %461 = vrcp.f32 %v228_v6 }
  0x72   : > { %v462_v7 = vpop.eup %461 }
  0x73   : > { %v234_v8 = vmul.f32 %v462_v7, %v232_v3  ;;  %383 = vst [vmem:[%s213_s19 + $0x10] sm:$0xff] %v462_v7 }
  0x75   : > { %237 = vst [vmem:[%s213_s19] sm:$0xff] %v234_v8 }
  0x76   : > { %536 = shalt.err (!%p533_p2)
}
  0x77   : > { %s537_s8 = scalar_lea.hbm %s803_s28, 384  ;;  %s541_s6 = scalar_lea.hbm %s856_s2, 768 }
  0x78   : > { %p538_p9 = scmp.ne.s32.totalorder %s803_s28, %s537_s8  ;;  %p542_p6 = scmp.lt.u32.totalorder %s803_s28, %s856_s2 }
  0x79   : > { %p543_p13 = scmp.lt.u32.totalorder %s541_s6, %s537_s8  ;;  %p545_p8 = scmp.lt.u32.totalorder %s537_s8, %s803_s28 }
  0x7a   : > { %p539_p11 = pnand %p538_p9, %p869_p0 }
  0x7b   : > { %p544_p5 = por %p543_p13, %p542_p6 }
  0x7c   : > { %p540_p3 = pneg %p539_p11 }
  0x7d   : > { %p546_p7 = por %p545_p8, %p544_p5 }
  0x7f   : > { %p547_p4 = pnand %p546_p7, %p540_p3 }
  0x81   : > { %550 = shalt.err (!%p547_p4)
}
  0x82   : > { %s614_s7 = smov 128   ;;  %s615_s19 = smov 8  }
  0x83   : > { %393 = dma.vmem_to_hbm [thread:$0]  (%p869_p0), %s805_s21, 384, %s803_s28, %s249_s29, %s614_s7, %s614_s7, %s615_s19  }
  0x84 PF: > { %s277_s30 = sand.u32 1, %s589_s9   ;;  %p870_p10 = scmp.ne.s32.totalorder %s862_s24, 0 }
  0x85   : > { %p871_p12 = scmp.ge.s32.totalorder %s609_s14, 2  ;;  %s278_s20 = scalar_lea.sflag [#allocation4], %s277_s30 }
  0x87   : > { %p403_p1 = pnand %p871_p12, %p870_p10 }
  0x89   : > { %584 = dma.done.wait (!%p403_p1), %s278_s20, 384  }
  0x8a   : > { %586 = vsyncadd (!%p403_p1), %s278_s20, 4294966912  ;;  %s21_s14 = sadd.s32 1, %s609_s14   ;;  %s872_s9 = smov %s593_s10 }
  0x8b   : > { %p18_p2 = scmp.ge.s32.totalorder %s21_s14, 4   ;;  %s873_s10 = smov %s597_s11 }
  0x8c   : > { %s874_s11 = smov %s687_s23  ;;  %s875_s12 = smov %s605_s13 }
  0x8d   : > { %s876_s13 = smov %s878_s17  ;;  %20 = sbr.rel (!%p18_p2) target bundleno = 8 (0x8), region = 92 }
  0x94   :  { %283 = vsyncpa [#allocation3], 1 }
  0x95   :  { %285 = vsyncpa [#allocation3 + $0x1], 1 }
  0x96   :  { %286 = vsyncpa [#allocation6], 1 }
  0x97   :  { %288 = vsyncpa [#allocation6 + $0x1], 1 }
  0x98   :  { %289 = vsyncpa [#allocation4], 1 }
  0x99   :  { %291 = vsyncpa [#allocation4 + $0x1], 1 }

</bundles_post_ra>
